<compile_context>
chip_gen: v5e
topology: v5e:2x2
jax: 0.10.0
libtpu: 0.0.40
codegen_flags: <defaults>
</compile_context>

<pallas_src>
import functools

import jax
import jax.numpy as jnp
from jax.experimental import pallas as pl
from jax.experimental.pallas import tpu as pltpu

KH, KW = 3, 3
C_IN, C_OUT = 3, 16
K_IM2COL = C_IN * KH * KW          # 27
BN_EPS = 1e-5


def _fusible_kernel(x_ref, w_ref, b_ref, o_ref, *, w_img, hw_pad):
    """BN-folded Conv2d(3->16, 3x3, valid) + ReLU, one batch element / channel group.

    x_ref: (1, C_IN, H*W)      lane-flattened NCHW input (BN folded into w/b)
    w_ref: (cg, K_IM2COL)      im2col weights for this channel group, K order (kh,kw,ci)
    b_ref: (cg, 1)             folded bias (column vector -> broadcasts over lanes)
    o_ref: (1, cg, hw_pad)     channel-major, lane-dense (128-multiple) output slab
    """
    x_flat = x_ref[0]                                     # (C_IN, H*W), lanes = H*W
    hw = x_flat.shape[-1]
    if hw_pad > hw:                                       # pad lanes to a 128 multiple
        x_flat = jnp.concatenate(
            [x_flat, jnp.zeros((C_IN, hw_pad - hw), x_flat.dtype)], axis=1)

    # im2col with K on sublanes: the 9 (kh,kw) taps are static lane shifts of the one
    # flattened tile; tap(kh,kw)[ci, m] == x[ci, i+kh, j+kw] for every valid output
    # position m = i*W + j (invalid edge positions hold garbage and are discarded by
    # the wrapper).
    taps = []
    for kh in range(KH):
        for kw in range(KW):
            s = kh * w_img + kw
            taps.append(jnp.roll(x_flat, -s, axis=1) if s else x_flat)
    patches = jnp.concatenate(taps, axis=0)               # (27, hw_pad), K = (kh,kw,ci)

    # Single MXU matmul; result is already channel-major & lane-dense.
    y = jnp.dot(w_ref[...], patches, preferred_element_type=jnp.float32)  # (cg, hw_pad)
    y = jnp.maximum(y + b_ref[...], 0.0)
    o_ref[0] = y.astype(o_ref.dtype)                      # one unmasked store


def fusible_forward(x_nchw, conv_w_oihw, conv_b, gamma, beta, run_mean, run_var):
    """x_nchw: (N, 3, H, W) float32 -> (N, 16, H-2, W-2) float32 (eval-mode BN)."""
    n, c, h, w = x_nchw.shape
    assert c == C_IN and h >= KH and w >= KW
    h_out, w_out = h - (KH - 1), w - (KW - 1)
    hw = h * w
    hw_pad = ((hw + 127) // 128) * 128                    # lane-dense (128-mult) slab

    # Flatten spatial dims in HBM (free metadata reshape of a contiguous array): the
    # DMA then delivers the lane-flattened layout directly, no in-kernel reshape.
    x_flat = x_nchw.astype(jnp.float32).reshape(n, C_IN, hw)

    # Fold eval-mode BatchNorm into the conv weights / bias (trace-time, tiny tensors).
    scale = gamma / jnp.sqrt(run_var + BN_EPS)            # (Cin,)
    shift = beta - run_mean * scale                       # (Cin,)
    w_f = conv_w_oihw.astype(jnp.float32) * scale[None, :, None, None]   # (O,I,kh,kw)
    b_f = conv_b.astype(jnp.float32) + jnp.einsum(
        "oihw,i->o", conv_w_oihw.astype(jnp.float32), shift)             # (O,)

    # Weight already in kernel layout: (C_OUT, 27), K ordered (kh, kw, ci).
    w2 = jnp.transpose(w_f, (0, 2, 3, 1)).reshape(C_OUT, K_IM2COL)
    b2 = b_f.reshape(C_OUT, 1)

    # Guarantee >= 2 grid steps (v7x: both TensorCores get work) even at batch==1 by
    # splitting output channels; at batch>=2 the batch axis already provides steps and
    # we avoid duplicating the im2col work on single-core chips.
    n_cg = 1 if n >= 2 else 2
    cg = C_OUT // n_cg

    # Rough per-step VMEM need; raise the scoped limit only if it exceeds the default.
    in_block = C_IN * hw * 4
    out_block = cg * hw_pad * 4
    interm = (9 * C_IN + K_IM2COL + 2 * cg) * hw_pad * 4
    vmem_est = 2 * (in_block + out_block) + interm + (2 << 20)
    vmem_limit = None if vmem_est <= (32 << 20) else min(vmem_est, 64 << 20)

    kernel = functools.partial(_fusible_kernel, w_img=w, hw_pad=hw_pad)

    out_slab = pl.pallas_call(
        kernel,
        out_shape=jax.ShapeDtypeStruct((n, C_OUT, hw_pad), jnp.float32),
        grid=(n, n_cg),
        in_specs=[
            pl.BlockSpec((1, C_IN, hw), lambda i, g: (i, 0, 0)),       # same block ∀ g
            pl.BlockSpec((cg, K_IM2COL), lambda i, g: (g, 0)),
            pl.BlockSpec((cg, 1), lambda i, g: (g, 0)),
        ],
        out_specs=pl.BlockSpec((1, cg, hw_pad), lambda i, g: (i, g, 0)),
        compiler_params=pltpu.CompilerParams(
            dimension_semantics=("parallel", "parallel"),
            vmem_limit_bytes=vmem_limit),
    )(x_flat, w2, b2)

    # Padded channel-major slab -> NCHW: pure slice + reshape + slice (no transpose).
    out = out_slab[:, :, :hw].reshape(n, C_OUT, h, w)[:, :, :h_out, :w_out]
    return out


def _reference(x_nchw, conv_w_oihw, conv_b, gamma, beta, run_mean, run_var):
    # Pure-JAX reference (eval-mode BN -> conv -> relu) for a sanity check.
    scale = gamma / jnp.sqrt(run_var + BN_EPS)
    shift = beta - run_mean * scale
    xbn = x_nchw * scale[None, :, None, None] + shift[None, :, None, None]
    out = jax.lax.conv_general_dilated(
        xbn, conv_w_oihw, window_strides=(1, 1), padding="VALID",
        dimension_numbers=("NCHW", "OIHW", "NCHW"))
    out = out + conv_b[None, :, None, None]
    return jnp.maximum(out, 0.0)


if __name__ == "__main__":
    key = jax.random.PRNGKey(0)
    k_x1, k_x2, k_w, k_b, k_m, k_v = jax.random.split(key, 6)

    # Deterministic parameter init (synthetic, not a checkpoint).
    conv_w = 0.1 * jax.random.normal(k_w, (C_OUT, C_IN, KH, KW), dtype=jnp.float32)
    conv_b = 0.01 * jax.random.normal(k_b, (C_OUT,), dtype=jnp.float32)
    gamma = jnp.array([1.0, 0.9, 1.1], dtype=jnp.float32)
    beta = jnp.array([0.0, 0.1, -0.1], dtype=jnp.float32)
    run_mean = 0.05 * jax.random.normal(k_m, (C_IN,), dtype=jnp.float32)
    run_var = (1.0 + 0.1 * jax.nn.softplus(
        jax.random.normal(k_v, (C_IN,)))).astype(jnp.float32)

    # Case 1: batch=2, 16x16 — batch-parallel grid path, H*W already a 128 multiple.
    x1 = jax.random.normal(k_x1, (2, C_IN, 16, 16), dtype=jnp.float32)
    out1 = jax.block_until_ready(
        fusible_forward(x1, conv_w, conv_b, gamma, beta, run_mean, run_var))
    ref1 = _reference(x1, conv_w, conv_b, gamma, beta, run_mean, run_var)
    assert out1.shape == (2, C_OUT, 14, 14), out1.shape
    assert jnp.allclose(out1, ref1, atol=1e-4, rtol=1e-4), float(
        jnp.max(jnp.abs(out1 - ref1)))

    # Case 2: batch=1, 12x12 — channel-group grid split (>=2 steps) + lane padding path.
    x2 = jax.random.normal(k_x2, (1, C_IN, 12, 12), dtype=jnp.float32)
    out2 = jax.block_until_ready(
        fusible_forward(x2, conv_w, conv_b, gamma, beta, run_mean, run_var))
    ref2 = _reference(x2, conv_w, conv_b, gamma, beta, run_mean, run_var)
    assert out2.shape == (1, C_OUT, 10, 10), out2.shape
    assert jnp.allclose(out2, ref2, atol=1e-4, rtol=1e-4), float(
        jnp.max(jnp.abs(out2 - ref2)))

    print("KERNEL_OK")
</pallas_src>

<mosaic_0001>
module attributes {stable_mosaic.version = 11 : i64} {
  func.func @_fusible_kernel(%arg0: i32, %arg1: i32, %arg2: memref<1x3x256xf32, #tpu.memory_space<vmem>>, %arg3: memref<16x27xf32, #tpu.memory_space<vmem>>, %arg4: memref<16x1xf32, #tpu.memory_space<vmem>>, %arg5: memref<1x16x256xf32, #tpu.memory_space<vmem>>) attributes {dimension_semantics = [#tpu.dimension_semantics<parallel>, #tpu.dimension_semantics<parallel>], iteration_bounds = array<i64: 2, 1>, scalar_prefetch = 0 : i64, scratch_operands = 0 : i64, tpu.core_type = #tpu.core_type<tc>, window_params = [{transform_indices = @transform_0, window_bounds = array<i64: 1, 3, 256>}, {transform_indices = @transform_1, window_bounds = array<i64: 16, 27>}, {transform_indices = @transform_2, window_bounds = array<i64: 16, 1>}, {transform_indices = @transform_3, window_bounds = array<i64: 1, 16, 256>}]} {
    %c0 = arith.constant 0 : index
    %c0_0 = arith.constant 0 : index
    %c0_1 = arith.constant 0 : index
    %0 = vector.load %arg2[%c0, %c0_0, %c0_1] : memref<1x3x256xf32, #tpu.memory_space<vmem>>, vector<1x3x256xf32>
    %1 = vector.shape_cast %0 : vector<1x3x256xf32> to vector<3x256xf32>
    %2 = vector.extract_strided_slice %1 {offsets = [0, 1], sizes = [3, 255], strides = [1, 1]} : vector<3x256xf32> to vector<3x255xf32>
    %3 = vector.extract_strided_slice %1 {offsets = [0, 0], sizes = [3, 1], strides = [1, 1]} : vector<3x256xf32> to vector<3x1xf32>
    %4 = tpu.concatenate %2, %3 in 1 : vector<3x255xf32>, vector<3x1xf32> -> vector<3x256xf32>
    %5 = vector.extract_strided_slice %1 {offsets = [0, 2], sizes = [3, 254], strides = [1, 1]} : vector<3x256xf32> to vector<3x254xf32>
    %6 = vector.extract_strided_slice %1 {offsets = [0, 0], sizes = [3, 2], strides = [1, 1]} : vector<3x256xf32> to vector<3x2xf32>
    %7 = tpu.concatenate %5, %6 in 1 : vector<3x254xf32>, vector<3x2xf32> -> vector<3x256xf32>
    %8 = vector.extract_strided_slice %1 {offsets = [0, 16], sizes = [3, 240], strides = [1, 1]} : vector<3x256xf32> to vector<3x240xf32>
    %9 = vector.extract_strided_slice %1 {offsets = [0, 0], sizes = [3, 16], strides = [1, 1]} : vector<3x256xf32> to vector<3x16xf32>
    %10 = tpu.concatenate %8, %9 in 1 : vector<3x240xf32>, vector<3x16xf32> -> vector<3x256xf32>
    %11 = vector.extract_strided_slice %1 {offsets = [0, 17], sizes = [3, 239], strides = [1, 1]} : vector<3x256xf32> to vector<3x239xf32>
    %12 = vector.extract_strided_slice %1 {offsets = [0, 0], sizes = [3, 17], strides = [1, 1]} : vector<3x256xf32> to vector<3x17xf32>
    %13 = tpu.concatenate %11, %12 in 1 : vector<3x239xf32>, vector<3x17xf32> -> vector<3x256xf32>
    %14 = vector.extract_strided_slice %1 {offsets = [0, 18], sizes = [3, 238], strides = [1, 1]} : vector<3x256xf32> to vector<3x238xf32>
    %15 = vector.extract_strided_slice %1 {offsets = [0, 0], sizes = [3, 18], strides = [1, 1]} : vector<3x256xf32> to vector<3x18xf32>
    %16 = tpu.concatenate %14, %15 in 1 : vector<3x238xf32>, vector<3x18xf32> -> vector<3x256xf32>
    %17 = vector.extract_strided_slice %1 {offsets = [0, 32], sizes = [3, 224], strides = [1, 1]} : vector<3x256xf32> to vector<3x224xf32>
    %18 = vector.extract_strided_slice %1 {offsets = [0, 0], sizes = [3, 32], strides = [1, 1]} : vector<3x256xf32> to vector<3x32xf32>
    %19 = tpu.concatenate %17, %18 in 1 : vector<3x224xf32>, vector<3x32xf32> -> vector<3x256xf32>
    %20 = vector.extract_strided_slice %1 {offsets = [0, 33], sizes = [3, 223], strides = [1, 1]} : vector<3x256xf32> to vector<3x223xf32>
    %21 = vector.extract_strided_slice %1 {offsets = [0, 0], sizes = [3, 33], strides = [1, 1]} : vector<3x256xf32> to vector<3x33xf32>
    %22 = tpu.concatenate %20, %21 in 1 : vector<3x223xf32>, vector<3x33xf32> -> vector<3x256xf32>
    %23 = vector.extract_strided_slice %1 {offsets = [0, 34], sizes = [3, 222], strides = [1, 1]} : vector<3x256xf32> to vector<3x222xf32>
    %24 = vector.extract_strided_slice %1 {offsets = [0, 0], sizes = [3, 34], strides = [1, 1]} : vector<3x256xf32> to vector<3x34xf32>
    %25 = tpu.concatenate %23, %24 in 1 : vector<3x222xf32>, vector<3x34xf32> -> vector<3x256xf32>
    %26 = tpu.concatenate %1, %4, %7, %10, %13, %16, %19, %22, %25 in 0 : vector<3x256xf32>, vector<3x256xf32>, vector<3x256xf32>, vector<3x256xf32>, vector<3x256xf32>, vector<3x256xf32>, vector<3x256xf32>, vector<3x256xf32>, vector<3x256xf32> -> vector<27x256xf32>
    %c0_2 = arith.constant 0 : index
    %c0_3 = arith.constant 0 : index
    %27 = vector.load %arg3[%c0_2, %c0_3] : memref<16x27xf32, #tpu.memory_space<vmem>>, vector<16x27xf32>
    %cst = arith.constant dense<0.000000e+00> : vector<16x256xf32>
    %28 = tpu.matmul %27, %26, %cst {dimension_numbers = #tpu.dot_dimension_numbers<[1], [0], [0], [1], [0, 0, 1, 1], [], []>} : vector<16x27xf32>, vector<27x256xf32>, vector<16x256xf32> -> vector<16x256xf32>
    %c0_4 = arith.constant 0 : index
    %c0_5 = arith.constant 0 : index
    %29 = vector.load %arg4[%c0_4, %c0_5] : memref<16x1xf32, #tpu.memory_space<vmem>>, vector<16x1xf32>
    %30 = vector.broadcast %29 : vector<16x1xf32> to vector<16x256xf32>
    %31 = arith.addf %28, %30 : vector<16x256xf32>
    %cst_6 = arith.constant 0.000000e+00 : f32
    %32 = vector.broadcast %cst_6 : f32 to vector<16x256xf32>
    %33 = arith.maximumf %31, %32 : vector<16x256xf32>
    %c0_7 = arith.constant 0 : index
    %c0_8 = arith.constant 0 : index
    %c0_9 = arith.constant 0 : index
    %34 = vector.load %arg5[%c0_7, %c0_8, %c0_9] : memref<1x16x256xf32, #tpu.memory_space<vmem>>, vector<1x16x256xf32>
    %35 = vector.shape_cast %34 : vector<1x16x256xf32> to vector<16x256xf32>
    %36 = vector.shape_cast %33 : vector<16x256xf32> to vector<1x16x256xf32>
    tpu.vector_store %arg5[%c0_7, %c0_8, %c0_9], %36 {strides = array<i32>} : memref<1x16x256xf32, #tpu.memory_space<vmem>>, vector<1x16x256xf32>,
    return
  }
  func.func @transform_0(%arg0: i32, %arg1: i32) -> (i32, i32, i32) {
    %c0_i32 = arith.constant 0 : i32
    %c0_i32_0 = arith.constant 0 : i32
    %c0_i32_1 = arith.constant 0 : i32
    return %arg0, %c0_i32, %c0_i32_0 : i32, i32, i32
  }
  func.func @transform_1(%arg0: i32, %arg1: i32) -> (i32, i32) {
    %c0_i32 = arith.constant 0 : i32
    %c0_i32_0 = arith.constant 0 : i32
    return %arg1, %c0_i32 : i32, i32
  }
  func.func @transform_2(%arg0: i32, %arg1: i32) -> (i32, i32) {
    %c0_i32 = arith.constant 0 : i32
    %c0_i32_0 = arith.constant 0 : i32
    return %arg1, %c0_i32 : i32, i32
  }
  func.func @transform_3(%arg0: i32, %arg1: i32) -> (i32, i32, i32) {
    %c0_i32 = arith.constant 0 : i32
    %c0_i32_0 = arith.constant 0 : i32
    return %arg0, %arg1, %c0_i32 : i32, i32, i32
  }
}

</mosaic_0001>

<bundles_post_ra>
// kernel: tpu_custom_call.1
= control target key start
LH: loop header
LB: loop body
LE: loop exit
PB: predicated region body
PF: predicated region fallthrough
CT: control target
= control target key end

     0   :  { %8 = vsyncpa [#allocation3], 0  ;;  %s1039_s0 = inlined_call_operand.vmem [shape: f32[2,3,256], index: 0, kind: input, shape index: {}]   ;;  %s1040_s1 = inlined_call_operand.vmem [shape: f32[16,27], index: 1, kind: input, shape index: {}]   ;;  %s1041_s2 = inlined_call_operand.vmem [shape: f32[16,1], index: 2, kind: input, shape index: {}]   ;;  %s1042_s3 = inlined_call_operand.hbm [shape: f32[2,16,256], index: 3, kind: output, shape index: {}]  }
   0x1   :  { %10 = vsyncpa [#allocation3 + $0x1], 0  ;;  %s866_s12 = smov 0   ;;  %s868_s13 = smov 0  }
   0x2   :  { %s870_s14 = smov 0   ;;  %s872_s15 = smov 0  }
   0x3   :  { %s874_s16 = smov 0   ;;  %s876_s17 = smov 0  }
   0x4 LB: > { %s621_s18 = sadd.s32 4294967295, %s833_s17   ;;  %s622_s19 = sadd.s32 4294967294, %s833_s17   ;;  %s833_s17 = sphi %s876_s17, %s16_s17   ;;  %s829_s16 = sphi %s874_s16, %s1049_s16   ;;  %s825_s15 = sphi %s872_s15, %s1048_s15   ;;  %s821_s14 = sphi %s870_s14, %s1047_s14   ;;  %s817_s13 = sphi %s868_s13, %s1046_s13   ;;  %s813_s12 = sphi %s866_s12, %s1045_s12  }
   0x5   : > { %s28_s20 = sadd.s32 1, %s829_s16  ;;  %s115_s21 = sadd.s32 1, %s821_s14 }
   0x6   : > { %p30_p0 = scmp.ge.s32.totalorder %s28_s20, 2  ;;  %p125_p1 = scmp.ne.s32.totalorder %s821_s14, %s817_s13 }
   0x7   : > { %p126_p2 = scmp.eq.s32.totalorder %s621_s18, 1  ;;  %p131_p3 = scmp.ne.s32.totalorder %s817_s13, %s813_s12 }
   0x8   : > { %s1051_s20 = smov (%p30_p0, %s28_s20), 0  ;;  %p132_p5 = scmp.eq.s32.totalorder %s622_s19, 1 }
   0x9   : > { %p906_p4 = por %p126_p2, %p125_p1  ;;  %s110_s23 = ssub.s32 %s829_s16, %s1051_s20 }
   0xa   : > { %p627_p6 = scmp.ge.s32.totalorder %s833_s17, 1  ;;  %p113_p7 = scmp.eq.s32.totalorder %s110_s23, 0 }
   0xb   : > { %p913_p8 = por %p132_p5, %p131_p3  ;;  %p176_p9 = scmp.lt.s32.totalorder %s833_s17, 3 }
   0xc   : > { %s919_s25 = scalar_select %p113_p7, %s821_s14, %s115_s21  }
   0xd   : > { %p177_p10 = pnand %p627_p6, %p176_p9 }
   0xe   : > { %p210_p11 = scmp.lt.s32.totalorder (!%p177_p10), %s825_s15, 1  ;;  %s835_s4 = smov (!%p177_p10), 112  }
   0xf   : > { %180 = sbr.rel (%p177_p10) target bundleno = 418 (0x1a2), region = 32  ;;  %s836_s5 = smov (!%p177_p10), 111  }
  0x10   : > { %s837_s6 = smov (!%p177_p10), 126   ;;  %s838_s7 = smov (!%p177_p10), 110  }
  0x11   : > { %s839_s8 = smov (!%p177_p10), 96   ;;  %s840_s9 = smov (!%p177_p10), 95  }
  0x12   : > { %s841_s10 = smov (!%p177_p10), 94   ;;  %s842_s11 = smov (!%p177_p10), 127  }
  0x14   : > { %s211_s26 = scalar_select %p210_p11, %s825_s15, 1  ;;  %vm253_vm0 = vcmask 1031168   ;;  %v422_v45 = vld [vmem:[%s1041_s2 + $0x8] sm:$0xff]  ;;  %v421_v46 = vld [vmem:[%s1041_s2] sm:$0xff]  ;;  %vm269_vm1 = vcmask 916480   ;;  %v843_v47 = vmov 0  }
  0x15   : > { %754 = vset.pattern.permute.xlu0 %v843_v47  ;;  %753 = vset.pattern.permute.xlu2 %v843_v47  ;;  %vm317_vm2 = vcmask 785408   ;;  %vm285_vm3 = vcmask 908288   ;;  %vm301_vm4 = vcmask 900096   ;;  %vm333_vm5 = vcmask 777216  }
  0x16   : > { %s642_s27 = sshll.u32 %s211_s26, 3  ;;  %vm404_vm6 = vcmask 1040384   ;;  %vm413_vm7 = vcmask 1041408   ;;  %vm349_vm8 = vcmask 769024   ;;  %vm398_vm9 = vcmask 1042432   ;;  %s775_s26 = scalar_lea.hbm %s1042_s3, 64 }
  0x17   : > { %s214_s30 = scalar_lea.vmem %s1039_s0, %s642_s27  ;;  %vm407_vm10 = vcmask 1043456   ;;  %vm416_vm11 = vcmask 1044480   ;;  %vm410_vm12 = vcmask 1046528   ;;  %vm237_vm13 = vcmask 1039360  }
  0x18   : > { %v926_v0 = vld [vmem:[%s214_s30] sm:$0x77]  ;;  %vm401_vm14 = vcmask 1045504   ;;  %vm433_vm15 = vcmask 220160   ;;  %s207_s30 = sand.u32 1, %s817_s13  }
  0x19   : > { %230 = vst [vmem:[#allocation1] ss:$2 sm:$0xff] %v926_v0 }
  0x20   : > { %v929_v1 = vld.sshfl [vmem:[#allocation1] sm:$0xff pattern:$0x75316420]  ;;  %v931_v2 = vld.sshfl [vmem:[#allocation1 + $0x8] sm:$0xff pattern:$0x75316420] }
  0x21   : > { %240 = vst [vmem:[#allocation1] ss:$2 sm:$0xff] %v926_v0  ;;  %v748_v30 = vpack.i.bf16 %v931_v2, %v929_v1 }
  0x28   : > { %v934_v3 = vld.sshfl [vmem:[#allocation1] sm:$0xff pattern:$0x75316420] }
  0x29   : > { %246 = vst [vmem:[#allocation1] ss:$2 sm:$0xff] %v926_v0 }
  0x30   : > { %v247_v4 = vld.sshfl [vmem:[#allocation1] sm:$0xff pattern:$0x75316420]  ;;  %v248_v5 = vld.sshfl [vmem:[#allocation1 + $0x8] sm:$0xff pattern:$0x75316420] }
  0x31   : > { %256 = vst [vmem:[#allocation1] ss:$2 sm:$0xff] %v926_v0  ;;  %v718_v14 = vpack.i.bf16 %v248_v5, %v247_v4 }
  0x33   : > { %719 = vrot.lane.b32.xlu2 %v718_v14, %s837_s6 }
  0x38   : > { %v257_v6 = vld.sshfl [vmem:[#allocation1] sm:$0xff pattern:$0x75316420] }
  0x39   : > { %262 = vst [vmem:[#allocation1] ss:$2 sm:$0xff] %v926_v0 }
  0x3b   : > { %258 = vrot.lane.b32.xlu2 %v257_v6, %s837_s6 }
  0x40   : > { %v263_v7 = vld.sshfl [vmem:[#allocation1] sm:$0xff pattern:$0x75316420]  ;;  %v264_v8 = vld.sshfl [vmem:[#allocation1 + $0x8] sm:$0xff pattern:$0x75316420] }
  0x41   : > { %272 = vst [vmem:[#allocation1] ss:$2 sm:$0xff] %v926_v0  ;;  %v723_v9 = vpack.i.bf16 %v264_v8, %v263_v7 }
  0x43   : > { %724 = vrot.lane.b32.xlu0 %v723_v9, %s835_s4 }
  0x48   : > { %v273_v10 = vld.sshfl [vmem:[#allocation1] sm:$0xff pattern:$0x75316420] }
  0x49   : > { %274 = vrot.lane.b32.xlu1 %v273_v10, %s835_s4  ;;  %278 = vst [vmem:[#allocation1] ss:$2 sm:$0xff] %v926_v0  ;;  %s628_s4 = sshll.u32 %s207_s30, 5 }
  0x50   : > { %v279_v11 = vld.sshfl [vmem:[#allocation1] sm:$0xff pattern:$0x75316420]  ;;  %v280_v12 = vld.sshfl [vmem:[#allocation1 + $0x8] sm:$0xff pattern:$0x75316420] }
  0x51   : > { %v728_v13 = vpack.i.bf16 %v280_v12, %v279_v11  ;;  %288 = vst [vmem:[#allocation1] ss:$2 sm:$0xff] %v926_v0 }
  0x53   : > { %729 = vrot.lane.b32.xlu1 %v728_v13, %s836_s5 }
  0x58   : > { %v289_v15 = vld.sshfl [vmem:[#allocation1] sm:$0xff pattern:$0x75316420] }
  0x59   : > { %294 = vst [vmem:[#allocation1] ss:$2 sm:$0xff] %v926_v0  ;;  %290 = vrot.lane.b32.xlu2 %v289_v15, %s836_s5  ;;  %s643_s5 = sshll.u32 %s825_s15, 5  ;;  %s500_s15 = scalar_lea.sflag [#allocation3], %s207_s30 }
  0x60   : > { %v295_v16 = vld.sshfl [vmem:[#allocation1] sm:$0xff pattern:$0x75316420]  ;;  %v296_v17 = vld.sshfl [vmem:[#allocation1 + $0x8] sm:$0xff pattern:$0x75316420] }
  0x61   : > { %v733_v18 = vpack.i.bf16 %v296_v17, %v295_v16  ;;  %304 = vst [vmem:[#allocation1] ss:$2 sm:$0xff] %v926_v0 }
  0x63   : > { %734 = vrot.lane.b32.xlu0 %v733_v18, %s838_s7 }
  0x68   : > { %v305_v19 = vld.sshfl [vmem:[#allocation1] sm:$0xff pattern:$0x75316420] }
  0x69   : > { %310 = vst [vmem:[#allocation1] ss:$2 sm:$0xff] %v926_v0 }
  0x6b   : > { %306 = vrot.lane.b32.xlu0 %v305_v19, %s838_s7 }
  0x70   : > { %v311_v20 = vld.sshfl [vmem:[#allocation1] sm:$0xff pattern:$0x75316420]  ;;  %v312_v21 = vld.sshfl [vmem:[#allocation1 + $0x8] sm:$0xff pattern:$0x75316420] }
  0x71   : > { %v738_v22 = vpack.i.bf16 %v312_v21, %v311_v20  ;;  %320 = vst [vmem:[#allocation1] ss:$2 sm:$0xff] %v926_v0 }
  0x73   : > { %739 = vrot.lane.b32.xlu1 %v738_v22, %s839_s8 }
  0x78   : > { %v321_v23 = vld.sshfl [vmem:[#allocation1] sm:$0xff pattern:$0x75316420] }
  0x79   : > { %326 = vst [vmem:[#allocation1] ss:$2 sm:$0xff] %v926_v0 }
  0x7b   : > { %322 = vrot.lane.b32.xlu1 %v321_v23, %s839_s8  ;;  %s514_s8 = scalar_lea.hbm %s1042_s3, %s643_s5 }
  0x80   : > { %v327_v24 = vld.sshfl [vmem:[#allocation1] sm:$0xff pattern:$0x75316420]  ;;  %v328_v25 = vld.sshfl [vmem:[#allocation1 + $0x8] sm:$0xff pattern:$0x75316420] }
  0x81   : > { %336 = vst [vmem:[#allocation1] ss:$2 sm:$0xff] %v926_v0  ;;  %v743_v26 = vpack.i.bf16 %v328_v25, %v327_v24 }
  0x83   : > { %744 = vrot.lane.b32.xlu2 %v743_v26, %s840_s9 }
  0x88   : > { %v337_v27 = vld.sshfl [vmem:[#allocation1] sm:$0xff pattern:$0x75316420] }
  0x89   : > { %338 = vrot.lane.b32.xlu0 %v337_v27, %s840_s9  ;;  %342 = vst [vmem:[#allocation1] ss:$2 sm:$0xff] %v926_v0  ;;  %s209_s9 = scalar_lea.vmem [#allocation2], %s628_s4 }
  0x8d   : > { %v720_v32 = vpop.permute.xlu2 %719 }
  0x8e   : > { %v722_v41 = vunpack.i.h.bf16 %v720_v32  ;;  %v721_v42 = vunpack.i.l.bf16 %v720_v32 }
  0x90   : > { %v344_v28 = vld.sshfl [vmem:[#allocation1 + $0x8] sm:$0xff pattern:$0x75316420]  ;;  %v343_v29 = vld.sshfl [vmem:[#allocation1] sm:$0xff pattern:$0x75316420]  ;;  %v961_v51 = vsel %vm253_vm0, %v721_v42, %v722_v41 }
  0x91   : > { %347 = vrot.lane.b32.xlu1 %v344_v28, %s841_s10  ;;  %345 = vrot.lane.b32.xlu0 %v343_v29, %s841_s10  ;;  %352 = vst [vmem:[#allocation1] ss:$2 sm:$0xff] %v926_v0  ;;  %v369_v1 = vrot.slane %v961_v51, 2 }
  0x95   : > { %v259_v35 = vpop.permute.xlu2 %258 }
  0x96   : > { %v965_v57 = vsel %vm253_vm0, %v722_v41, %v259_v35 }
  0x97   : > { %v370_v4 = vrot.slane %v965_v57, 2 }
  0x98   : > { %v353_v31 = vld.sshfl [vmem:[#allocation1] sm:$0xff pattern:$0x75316420] }
  0x99   : > { %749 = vrot.lane.b32.xlu0 %v748_v30, %s842_s11  ;;  %242 = vrot.lane.b32.xlu1 %v934_v3, %s842_s11  ;;  %358 = vst [vmem:[#allocation1] ss:$2 sm:$0xff] %v926_v0  ;;  %s517_s11 = sshll.u32 %s514_s8, 4  ;;  %s518_s11 = int_to_ptr.hbm [resolvable:$true] %s517_s11 }
  0x9a   : > { %354 = vrot.lane.b32.xlu2 %v353_v31, %s841_s10  ;;  %s515_s10 = sshll.u32 %s209_s9, 4  ;;  %s769_s18 = sshra.s32 %s518_s11, 4  ;;  %s516_s10 = int_to_ptr.vmem [resolvable:$true] %s515_s10  ;;  %s770_s18 = int_to_ptr.hbm [resolvable:$true] %s769_s18 }
  0x9b   : > { %s771_s19 = scalar_lea.hbm %s770_s18, 32  ;;  %p776_p1 = scmp.lt.s32.totalorder %s770_s18, %s1042_s3 }
  0x9c   : > { %p772_p12 = scmp.ne.s32.totalorder %s770_s18, %s771_s19  ;;  %p777_p2 = scmp.lt.s32.totalorder %s775_s26, %s771_s19 }
  0x9e   : > { %p773_p13 = pnand %p772_p12, %p906_p4  ;;  %p778_p3 = por %p777_p2, %p776_p1 }
  0xa0   : > { %v360_v41 = vld.sshfl [vmem:[#allocation1 + $0x8] sm:$0xff pattern:$0x75316420]  ;;  %p774_p0 = pneg %p773_p13 }
  0xa1   : > { %430 = vperm.xlu0 %754, %v422_v45  }
  0xa2   : > { %425 = vperm.xlu2 %753, %v421_v46   ;;  %p779_p5 = pnand %p778_p3, %p774_p0 }
  0xb3   : > { %v291_v38 = vpop.permute.xlu2 %290 }
  0xb5   : > { %v725_v34 = vpop.permute.xlu0 %724 }
  0xb6   : > { %v727_v43 = vunpack.i.h.bf16 %v725_v34  ;;  %v726_v44 = vunpack.i.l.bf16 %v725_v34 }
  0xb8   : > { %v270_v54 = vsel %vm269_vm1, %v726_v44, %v727_v43 }
  0xb9   : > { %v374_v0 = vrot.slane %v270_v54, 7 }
  0xbb   : > { %v275_v33 = vpop.permute.xlu1 %274  ;;  %v405_v16 = vsel %vm404_vm6, %v369_v1, %v374_v0 }
  0xbc   : > { %v277_v62 = vsel %vm269_vm1, %v727_v43, %v275_v33 }
  0xbd   : > { %v375_v6 = vrot.slane %v277_v62, 7 }
  0xbf   : > { %v406_v23 = vsel %vm404_vm6, %v370_v4, %v375_v6 }
  0xc5   : > { %v730_v36 = vpop.permute.xlu1 %729 }
  0xc6   : > { %v732_v52 = vunpack.i.h.bf16 %v730_v36  ;;  %v731_v53 = vunpack.i.l.bf16 %v730_v36 }
  0xc8   : > { %v286_v2 = vsel %vm285_vm3, %v731_v53, %v732_v52  ;;  %v293_v3 = vsel %vm285_vm3, %v732_v52, %v291_v38 }
  0xc9   : > { %v379_v10 = vrot.slane %v286_v2, 4  ;;  %v380_v11 = vrot.slane %v293_v3, 4 }
  0xcb   : > { %v408_v27 = vsel %vm407_vm10, %v405_v16, %v379_v10  ;;  %v409_v30 = vsel %vm407_vm10, %v406_v23, %v380_v11 }
  0xd5   : > { %v735_v37 = vpop.permute.xlu0 %734 }
  0xd6   : > { %v737_v55 = vunpack.i.h.bf16 %v735_v37  ;;  %v736_v56 = vunpack.i.l.bf16 %v735_v37 }
  0xd8   : > { %v302_v5 = vsel %vm301_vm4, %v736_v56, %v737_v55 }
  0xd9   : > { %v384_v13 = vrot.slane %v302_v5, 1 }
  0xdb   : > { %v411_v32 = vsel %vm410_vm12, %v408_v27, %v384_v13 }
  0xdd   : > { %v307_v40 = vpop.permute.xlu0 %306  ;;  %v745_v50 = vpop.permute.xlu2 %744 }
  0xde   : > { %v747_v58 = vunpack.i.h.bf16 %v745_v50  ;;  %v746_v59 = vunpack.i.l.bf16 %v745_v50  ;;  %v309_v14 = vsel %vm301_vm4, %v737_v55, %v307_v40  ;;  %v359_v40 = vld.sshfl [vmem:[#allocation1] sm:$0xff pattern:$0x75316420] }
  0xdf   : > { %v385_v24 = vrot.slane %v309_v14, 1 }
  0xe0   : > { %v334_v9 = vsel %vm333_vm5, %v746_v59, %v747_v58 }
  0xe1   : > { %v394_v18 = vrot.slane %v334_v9, 3  ;;  %v412_v33 = vsel %vm410_vm12, %v409_v30, %v385_v24 }
  0xe5   : > { %v740_v39 = vpop.permute.xlu1 %739 }
  0xe6   : > { %v742_v48 = vunpack.i.h.bf16 %v740_v39  ;;  %v741_v49 = vunpack.i.l.bf16 %v740_v39 }
  0xe8   : > { %v318_v63 = vsel %vm317_vm2, %v741_v49, %v742_v48  ;;  %v419_v49 = vld [vmem:[%s1040_s1] sm:$0xff] }
  0xe9   : > { %v389_v7 = vrot.slane %v318_v63, 6 }
  0xeb   : > { %v414_v22 = vsel %vm413_vm7, %v384_v13, %v389_v7 }
  0xec   : > { %v417_v28 = vsel %vm416_vm11, %v414_v22, %v394_v18 }
  0xed   : > { %v323_v60 = vpop.permute.xlu1 %322 }
  0xee   : > { %v325_v8 = vsel %vm317_vm2, %v742_v48, %v323_v60  ;;  %v420_v48 = vld [vmem:[%s1040_s1 + $0x8] sm:$0xff] }
  0xef   : > { %v390_v17 = vrot.slane %v325_v8, 6 }
  0xf1   : > { %v415_v29 = vsel %vm413_vm7, %v385_v24, %v390_v17 }
  0xf4   : > { %v355_v15 = vpop.permute.xlu2 %354 }
  0xfb   : > { %v339_v61 = vpop.permute.xlu0 %338 }
  0xfc   : > { %v341_v12 = vsel %vm333_vm5, %v747_v58, %v339_v61  ;;  %v426_v50 = vpop.permute.xlu2 %425 }
  0xfd   : > { %v395_v19 = vrot.slane %v341_v12, 3 }
  0xff   : > { %v418_v31 = vsel %vm416_vm11, %v415_v29, %v395_v19 }
 0x103   : > { %v348_v20 = vpop.permute.xlu1 %347  ;;  %v346_v21 = vpop.permute.xlu0 %345 }
 0x104   : > { %v350_v25 = vsel %vm349_vm8, %v346_v21, %v348_v20  ;;  %v357_v26 = vsel %vm349_vm8, %v348_v20, %v355_v15 }
 0x105   : > { %631 = vmatpush.msk.msra.mxu0 %vm398_vm9, %v350_v25  ;;  %644 = vmatpush.msk.msra.mxu2 %vm398_vm9, %v350_v25 }
 0x106   : > { %634 = vmatpush.msk.msra.mxu1 %vm398_vm9, %v357_v26  ;;  %648 = vmatpush.msk.msra.mxu3 %vm398_vm9, %v357_v26 }
 0x107   : > { %458 = vmatpush.msra.mxu0 %v417_v28  ;;  %645 = vmatpush.msra.mxu2 %v417_v28 }
 0x108   : > { %481 = vmatpush.msra.mxu1 %v418_v31  ;;  %649 = vmatpush.msra.mxu3 %v418_v31 }
 0x109   : > { %459 = vmatpush.msra.mxu0 %v411_v32  ;;  %646 = vmatpush.msra.mxu2 %v411_v32 }
 0x10a   : > { %482 = vmatpush.msra.mxu1 %v412_v33  ;;  %650 = vmatpush.msra.mxu3 %v412_v33 }
 0x10b   : > { %v750_v34 = vpop.permute.xlu0 %749  ;;  %v243_v35 = vpop.permute.xlu1 %242 }
 0x10c   : > { %v752_v36 = vunpack.i.h.bf16 %v750_v34  ;;  %v751_v37 = vunpack.i.l.bf16 %v750_v34 }
 0x10e   : > { %v238_v38 = vsel %vm237_vm13, %v751_v37, %v752_v36  ;;  %v245_v39 = vsel %vm237_vm13, %v752_v36, %v243_v35 }
 0x10f   : > { %v364_v42 = vrot.slane %v238_v38, 5  ;;  %v365_v43 = vrot.slane %v245_v39, 5 }
 0x111   : > { %v399_v44 = vsel %vm398_vm9, %v359_v40, %v364_v42  ;;  %v400_v45 = vsel %vm398_vm9, %v360_v41, %v365_v43 }
 0x112   : > { %v402_v46 = vsel %vm401_vm14, %v399_v44, %v369_v1  ;;  %v403_v47 = vsel %vm401_vm14, %v400_v45, %v370_v4 }
 0x113   : > { %460 = vmatpush.msra.mxu0 %v402_v46  ;;  %647 = vmatpush.msra.mxu2 %v402_v46  ;;  %v431_v55 = vpop.permute.xlu0 %430 }
 0x114   : > { %483 = vmatpush.msra.mxu1 %v403_v47  ;;  %651 = vmatpush.msra.mxu3 %v403_v47 }
 0x115   : > { %633 = vmatmul.msk.f32.vlgmr.msra.gmra.mxu2 %vm433_vm15, %v420_v48  ;;  %636 = vmatmul.msk.f32.vlgmr.msra.gmra.mxu3 %vm433_vm15, %v420_v48 }
 0x116   : > { %632 = vmatmul.msk.f32.vlgmr.msra.gmra.mxu0 %vm433_vm15, %v419_v49  ;;  %635 = vmatmul.msk.f32.vlgmr.msra.gmra.mxu1 %vm433_vm15, %v419_v49 }
 0x193   : > { %v462_v51 = vpop.f32.mrf.mxu0  ;;  %v485_v52 = vpop.f32.mrf.mxu1 }
 0x194   : > { %v463_v53 = vadd.f32 %v462_v51, %v426_v50  ;;  %v486_v54 = vadd.f32 %v485_v52, %v426_v50 }
 0x196   : > { %v491_v56 = vmax.f32 %v463_v53, 0.0  ;;  %v492_v57 = vmax.f32 %v486_v54, 0.0 }
 0x198   : > { %495 = vst [vmem:[%s209_s9] sm:$0xff] %v491_v56  ;;  %v465_v58 = vpop.f32.mrf.mxu2  ;;  %v488_v59 = vpop.f32.mrf.mxu3 }
 0x199   : > { %v466_v60 = vadd.f32 %v465_v58, %v431_v55  ;;  %496 = vst [vmem:[%s209_s9 + $0x8] sm:$0xff] %v492_v57  ;;  %v489_v61 = vadd.f32 %v488_v59, %v431_v55 }
 0x19b   : > { %v493_v62 = vmax.f32 %v466_v60, 0.0  ;;  %v494_v63 = vmax.f32 %v489_v61, 0.0 }
 0x19d   : > { %497 = vst [vmem:[%s209_s9 + $0x10] sm:$0xff] %v493_v62 }
 0x19e   : > { %498 = vst [vmem:[%s209_s9 + $0x18] sm:$0xff] %v494_v63 }
 0x19f   : > { %782 = shalt.err (!%p779_p5)
}
 0x1a0   : > { %s844_s29 = smov 256   ;;  %s845_s30 = smov 16  }
 0x1a1   : > { %652 = dma.vmem_to_hbm [thread:$0]  (%p906_p4), %s516_s10, 512, %s518_s11, %s500_s15, %s844_s29, %s844_s29, %s845_s30  }
 0x1a2 PF: > { %p658_p6 = scmp.ge.s32.totalorder %s833_s17, 2  ;;  %s532_s4 = sand.u32 1, %s813_s12  }
 0x1a3   : > { %s533_s5 = scalar_lea.sflag [#allocation3], %s532_s4 }
 0x1a4   : > { %p655_p7 = pnand %p658_p6, %p913_p8 }
 0x1a6   : > { %p656_p9 = pneg %p655_p7 }
 0x1a8   : > { %808 = dma.done.wait (%p656_p9), %s533_s5, 512  }
 0x1a9   : > { %810 = vsyncadd (%p656_p9), %s533_s5, 4294966784  ;;  %s16_s17 = sadd.s32 1, %s833_s17   ;;  %s1045_s12 = smov %s817_s13 }
 0x1aa   : > { %p13_p10 = scmp.ge.s32.totalorder %s16_s17, 4   ;;  %s1046_s13 = smov %s821_s14 }
 0x1ab   : > { %s1047_s14 = smov %s919_s25  ;;  %s1048_s15 = smov %s829_s16 }
 0x1ac   : > { %s1049_s16 = smov %s1051_s20  ;;  %15 = sbr.rel (!%p13_p10) target bundleno = 4 (0x4), region = 73 }
 0x1b1   :  { %539 = vsyncpa [#allocation3], 1 }
 0x1b2   :  { %541 = vsyncpa [#allocation3 + $0x1], 1 }

</bundles_post_ra>
